<compile_context>
chip_gen: v6e
topology: v6e:2x2x1
jax: 0.10.0
libtpu: 0.0.40
codegen_flags: <defaults>
</compile_context>

<pallas_src>
import jax
import jax.numpy as jnp
from jax import lax
from jax.experimental import pallas as pl
from jax.experimental.pallas import tpu as pltpu


_COLS = 1024      # lane-dense width, multiple of 128
_SUBLANES = 8     # (8, 128) alignment granularity
_MAX_TM = 512     # 512 x 1024 x 4B = 2 MiB per tile


def _bitwise_not_kernel(x_ref, o_ref):
    # Pure VPU elementwise NOT on the whole VMEM tile.
    o_ref[...] = jnp.bitwise_not(x_ref[...])


def _ceil_to(n, m):
    return ((n + m - 1) // m) * m


def bitwise_not_pallas(x, y):
    """Mimics torch.bitwise_not(x, out=y): returns ~x (y gives shape/dtype)."""
    assert x.shape == y.shape and x.dtype == y.dtype, "out tensor must match input"

    # Zero-size case: nothing to compute, return an empty array of the right type.
    if x.size == 0:
        return jnp.empty(x.shape, dtype=x.dtype)

    orig_shape = x.shape
    orig_dtype = x.dtype

    # TODO(synk): bool inputs need a logical-not path (bit-pattern NOT on a
    # packed byte is not a valid bool); only integer dtypes are handled here.
    assert jnp.issubdtype(orig_dtype, jnp.integer), "integer dtypes only"

    flat = x.reshape(-1)
    n = flat.shape[0]

    # Pack sub-32-bit integers into int32 words (bitwise NOT is bit-exact).
    itemsize = jnp.dtype(orig_dtype).itemsize
    packed = itemsize < 4
    if packed:
        ratio = 4 // itemsize
        n_pad_pack = _ceil_to(n, ratio)
        if n_pad_pack != n:
            flat = jnp.pad(flat, (0, n_pad_pack - n))
        flat = lax.bitcast_convert_type(flat.reshape(-1, ratio), jnp.int32)
    n_words = flat.shape[0]
    work_dtype = flat.dtype

    # Pad to a lane/sublane-dense slab: cols = 1024, rows a multiple of 8.
    chunk = _COLS * _SUBLANES
    n_padded = _ceil_to(n_words, chunk)
    if n_padded != n_words:
        flat = jnp.pad(flat, (0, n_padded - n_words))
    rows = n_padded // _COLS
    slab = flat.reshape(rows, _COLS)

    # Tile along rows; pad rows to a multiple of the tile so every block is
    # full-sized and unmasked (no ragged last tile).
    tm = min(_MAX_TM, rows)
    if rows % tm != 0:
        pad_rows = _ceil_to(rows, tm) - rows
        slab = jnp.pad(slab, ((0, pad_rows), (0, 0)))
        rows += pad_rows

    out_slab = pl.pallas_call(
        _bitwise_not_kernel,
        out_shape=jax.ShapeDtypeStruct((rows, _COLS), work_dtype),
        grid=(rows // tm,),
        in_specs=[pl.BlockSpec((tm, _COLS), lambda i: (i, 0))],
        out_specs=pl.BlockSpec((tm, _COLS), lambda i: (i, 0)),
        input_output_aliases={0: 0},
        compiler_params=pltpu.CompilerParams(
            dimension_semantics=("parallel",),
            vmem_limit_bytes=32 * 1024 * 1024,
        ),
    )(slab)

    out_flat = out_slab.reshape(-1)[:n_words]
    if packed:
        out_flat = lax.bitcast_convert_type(out_flat, orig_dtype).reshape(-1)[:n]
    return out_flat.reshape(orig_shape)


if __name__ == "__main__":
    key = jax.random.PRNGKey(0)
    k1, k2 = jax.random.split(key)

    # Small non-empty int32 input to exercise the tiled kernel.
    x = jax.random.randint(k1, (2, 4, 16, 16), minval=-1000, maxval=1000,
                           dtype=jnp.int32)
    y = jnp.zeros_like(x)  # plays the role of torch's out= tensor
    out = jax.block_until_ready(bitwise_not_pallas(x, y))
    assert out.shape == x.shape and out.dtype == x.dtype
    assert bool(jnp.all(out == jnp.bitwise_not(x)))

    # int8 input exercises the packed-int32 path (odd element count too).
    x8 = jax.random.randint(k2, (3, 101), minval=-128, maxval=127,
                            dtype=jnp.int8)
    y8 = jnp.zeros_like(x8)
    out8 = jax.block_until_ready(bitwise_not_pallas(x8, y8))
    assert out8.shape == x8.shape and out8.dtype == x8.dtype
    assert bool(jnp.all(out8 == jnp.bitwise_not(x8)))

    # Zero-size case (the case this module is named after).
    x0 = jnp.zeros((0, 128), dtype=jnp.int32)
    y0 = jnp.zeros((0, 128), dtype=jnp.int32)
    out0 = jax.block_until_ready(bitwise_not_pallas(x0, y0))
    assert out0.shape == (0, 128) and out0.dtype == jnp.int32

    print("KERNEL_OK")
</pallas_src>

<mosaic_0001>
module attributes {stable_mosaic.version = 11 : i64} {
  func.func @_bitwise_not_kernel(%arg0: i32, %arg1: memref<8x1024xi32, #tpu.memory_space<vmem>>, %arg2: memref<8x1024xi32, #tpu.memory_space<vmem>>) attributes {dimension_semantics = [#tpu.dimension_semantics<parallel>], iteration_bounds = array<i64: 1>, scalar_prefetch = 0 : i64, scratch_operands = 0 : i64, tpu.core_type = #tpu.core_type<tc>, window_params = [{transform_indices = @transform_0, window_bounds = array<i64: 8, 1024>}, {transform_indices = @transform_1, window_bounds = array<i64: 8, 1024>}]} {
    %c0 = arith.constant 0 : index
    %c0_0 = arith.constant 0 : index
    %0 = vector.load %arg1[%c0, %c0_0] : memref<8x1024xi32, #tpu.memory_space<vmem>>, vector<8x1024xi32>
    %cst = arith.constant dense<-1> : vector<8x1024xi32>
    %1 = arith.xori %0, %cst : vector<8x1024xi32>
    %c0_1 = arith.constant 0 : index
    %c0_2 = arith.constant 0 : index
    %2 = vector.load %arg2[%c0_1, %c0_2] : memref<8x1024xi32, #tpu.memory_space<vmem>>, vector<8x1024xi32>
    tpu.vector_store %arg2[%c0_1, %c0_2], %1 {strides = array<i32>} : memref<8x1024xi32, #tpu.memory_space<vmem>>, vector<8x1024xi32>,
    return
  }
  func.func @transform_0(%arg0: i32) -> (i32, i32) {
    %c0_i32 = arith.constant 0 : i32
    %c0_i32_0 = arith.constant 0 : i32
    return %arg0, %c0_i32 : i32, i32
  }
  func.func @transform_1(%arg0: i32) -> (i32, i32) {
    %c0_i32 = arith.constant 0 : i32
    %c0_i32_0 = arith.constant 0 : i32
    return %arg0, %c0_i32 : i32, i32
  }
}

</mosaic_0001>

<bundles_post_ra>
// kernel: tpu_custom_call.1
= control target key start
LH: loop header
LB: loop body
LE: loop exit
PB: predicated region body
PF: predicated region fallthrough
CT: control target
= control target key end

     0   :  { %6 = vsyncpa [#allocation3], 0  ;;  %s124_s0 = inlined_call_operand.hbm [shape: s32[8,1024], index: 0, kind: input, shape index: {}, may-alias: {0,1}]   ;;  %s125_s1 = inlined_call_operand.hbm [shape: s32[8,1024], index: 1, kind: output, shape index: {}, may-alias: {0,1}]  }
   0x1   :  { %7 = vsyncpa [#allocation4], 0  ;;  %s106_s6 = smov [#allocation2]  }
   0x2   :  { %s14_s7 = sshll.u32 %s106_s6, 4  ;;  %s15_s7 = int_to_ptr.vmem [resolvable:$true] %s14_s7 }
   0x3   :  { %s70_s8 = scalar_lea.vmem %s15_s7, 1024  ;;  %p75_p1 = scmp.lt.s32.totalorder %s15_s7, %s15_s7 }
   0x4   :  { %p71_p0 = scmp.ne.s32.totalorder %s15_s7, %s70_s8  ;;  %p76_p2 = scmp.lt.s32.totalorder %s70_s8, %s70_s8 }
   0x6   :  { %p77_p3 = por %p76_p2, %p75_p1 }
   0x8   :  { %p78_p4 = pnand %p77_p3, %p71_p0 }
   0xa   :  { %81 = shalt.err (!%p78_p4)
}
   0xb   :  { %17 = dma.hbm_to_vmem [thread:$0]  %s124_s0, 1024, %s15_s7, [#allocation3]  }
   0xc   :  { %102 = dma.done.wait [#allocation3], 1024  }
   0xd   :  { %103 = vsyncadd [#allocation3], 4294966272  ;;  %v21_v0 = vld [vmem:[#allocation2] sm:$0xff]  ;;  %v22_v1 = vld [vmem:[#allocation2 + $0x8] sm:$0xff]  ;;  %s107_s11 = smov [#allocation5]  }
   0xe   :  { %v23_v2 = vld [vmem:[#allocation2 + $0x10] sm:$0xff]  ;;  %s51_s12 = sshll.u32 %s107_s11, 4  ;;  %v29_v3 = vxor.u32 4294967295, %v21_v0  ;;  %v30_v4 = vxor.u32 4294967295, %v22_v1  ;;  %v24_v6 = vld [vmem:[#allocation2 + $0x18] sm:$0xff]  ;;  %v25_v7 = vld [vmem:[#allocation2 + $0x20] sm:$0xff]  ;;  %s52_s12 = int_to_ptr.vmem [resolvable:$true] %s51_s12 }
   0xf   :  { %v31_v5 = vxor.u32 4294967295, %v23_v2  ;;  %v26_v8 = vld [vmem:[#allocation2 + $0x28] sm:$0xff]  ;;  %v32_v9 = vxor.u32 4294967295, %v24_v6  ;;  %v33_v10 = vxor.u32 4294967295, %v25_v7  ;;  %v27_v12 = vld [vmem:[#allocation2 + $0x30] sm:$0xff]  ;;  %v28_v13 = vld [vmem:[#allocation2 + $0x38] sm:$0xff]  ;;  %p87_p6 = scmp.lt.s32.totalorder %s52_s12, %s52_s12 }
  0x10   :  { %v34_v11 = vxor.u32 4294967295, %v26_v8  ;;  %37 = vst [vmem:[#allocation5] sm:$0xff] %v29_v3  ;;  %38 = vst [vmem:[#allocation5 + $0x8] sm:$0xff] %v30_v4  ;;  %v35_v14 = vxor.u32 4294967295, %v27_v12  ;;  %v36_v15 = vxor.u32 4294967295, %v28_v13  ;;  %s82_s0 = scalar_lea.vmem %s52_s12, 1024 }
  0x11   :  { %39 = vst [vmem:[#allocation5 + $0x10] sm:$0xff] %v31_v5  ;;  %40 = vst [vmem:[#allocation5 + $0x18] sm:$0xff] %v32_v9  ;;  %p83_p5 = scmp.ne.s32.totalorder %s52_s12, %s82_s0  ;;  %p88_p7 = scmp.lt.s32.totalorder %s82_s0, %s82_s0 }
  0x12   :  { %41 = vst [vmem:[#allocation5 + $0x20] sm:$0xff] %v33_v10  ;;  %42 = vst [vmem:[#allocation5 + $0x28] sm:$0xff] %v34_v11 }
  0x13   :  { %43 = vst [vmem:[#allocation5 + $0x30] sm:$0xff] %v35_v14  ;;  %44 = vst [vmem:[#allocation5 + $0x38] sm:$0xff] %v36_v15  ;;  %p89_p8 = por %p88_p7, %p87_p6 }
  0x15   :  { %p90_p9 = pnand %p89_p8, %p83_p5 }
  0x17   :  { %93 = shalt.err (!%p90_p9)
}
  0x18   :  { %54 = dma.vmem_to_hbm [thread:$0]  %s52_s12, 1024, %s125_s1, [#allocation4]  }
  0x19   :  { %104 = dma.done.wait [#allocation4], 1024  }
  0x1a   :  { %105 = vsyncadd [#allocation4], 4294966272 }
  0x1b   :  { %58 = vsyncpa [#allocation3], 1 }
  0x1c   :  { %59 = vsyncpa [#allocation4], 1 }

</bundles_post_ra>
